<compile_context>
chip_gen: v5e
topology: v5e:2x2
jax: 0.10.0
libtpu: 0.0.40
codegen_flags: <defaults>
</compile_context>

<pallas_src>
import jax
import jax.numpy as jnp
from jax import lax
from jax.experimental import pallas as pl
from jax.experimental.pallas import tpu as pltpu


def _round_up(x: int, m: int) -> int:
    return ((x + m - 1) // m) * m


def _gram_chunk_kernel(x_ref, y_ref, a_ref, b_ref, misc_ref):
    """Process one (TM, Dp) row chunk of X and Y.

    Outputs (block index depends only on the parallel axis, so they stay
    VMEM-resident and accumulate across the row-chunk axis):
      a_ref    (1, Dp, Dp): partial X^T X for this parallel group
      b_ref    (1, Dp, Dp): partial Y^T Y for this parallel group
      misc_ref (1, 8, 128): lane 0 = partial trace(G) = sum(X*Y)
                            lane 1 = partial sum_i G[i,i]^2
    """
    k = pl.program_id(1)

    @pl.when(k == 0)
    def _init():
        a_ref[...] = jnp.zeros_like(a_ref)
        b_ref[...] = jnp.zeros_like(b_ref)
        misc_ref[...] = jnp.zeros_like(misc_ref)

    x = x_ref[...]                     # (TM, Dp), original dtype -> MXU feed
    y = y_ref[...]                     # (TM, Dp)

    # D x D Gram updates on the MXU; contract the row (sublane) axis of both
    # operands, so no explicit transpose of x / y is materialized.
    contract_rows = (((0,), (0,)), ((), ()))
    ga = lax.dot_general(x, x, contract_rows, preferred_element_type=jnp.float32)
    gb = lax.dot_general(y, y, contract_rows, preferred_element_type=jnp.float32)
    a_ref[...] += ga[None, :, :]
    b_ref[...] += gb[None, :, :]

    # O(TM * Dp) elementwise terms for trace(G) and sum_i G[i,i]^2 (per-row dots
    # of corresponding rows).  XLU reductions overlap the MXU work above.
    xy = x.astype(jnp.float32) * y.astype(jnp.float32)
    rs = jnp.sum(xy, axis=1, keepdims=True)          # (TM, 1) per-row <x_r, y_r>
    trace_chunk = jnp.sum(rs)                        # scalar f32
    diag_sq_chunk = jnp.sum(rs * rs)                 # scalar f32

    lane = lax.broadcasted_iota(jnp.int32, misc_ref.shape, 2)
    misc_ref[...] += jnp.where(lane == 0, trace_chunk,
                               jnp.where(lane == 1, diag_sq_chunk, 0.0))


def reg_spectral_loss(inputs, lagged, reg: float = 1e-5, *, max_chunk_rows: int = 2048):
    """Pallas TPU implementation of RegSpectralLoss.__call__ for (N, D) inputs."""
    assert inputs.ndim == 2 and inputs.shape == lagged.shape
    n, d = inputs.shape
    if n < 2:
        raise ValueError("RegSpectralLoss needs N >= 2 samples (divides by N*(N-1)).")

    d_pad = _round_up(max(d, 128), 128)          # feature axis -> full 128 lanes
    if d_pad > 1024:
        # TODO(synk): feature-axis (K) blocking of the DxD Gram accumulators for
        # D_pad > 1024, plus an O(N^2 D) tiled fallback for the D >> N regime.
        raise NotImplementedError("reg_spectral_loss: D > 1024 not yet supported")

    itemsize = jnp.dtype(inputs.dtype).itemsize

    # Row-chunk size TM: as large as a conservative (v7x-safe) VMEM budget allows.
    # fixed = Gram output blocks (double-buffered) + misc slab + slack;
    # per_row = X and Y chunks, double-buffered.
    budget = 40 << 20
    fixed = 2 * 2 * d_pad * d_pad * 4 + 2 * 8 * 128 * 4 + (2 << 20)
    per_row = 2 * 2 * d_pad * itemsize
    tm = int((budget - fixed) // per_row)
    tm = max(8, min(tm, 2048, int(max_chunk_rows), _round_up(n, 8)))
    tm = (tm // 8) * 8

    total_chunks = -(-n // tm)
    if total_chunks >= 2 and total_chunks % 2 == 1:
        total_chunks += 1                         # even chunk count -> both v7x TCs busy
    num_par = 2 if total_chunks >= 2 else 1       # leading "parallel" axis
    chunks_per_par = total_chunks // num_par
    n_pad = total_chunks * tm

    x, y = inputs, lagged
    if (n_pad, d_pad) != (n, d):
        x = jnp.pad(x, ((0, n_pad - n), (0, d_pad - d)))
        y = jnp.pad(y, ((0, n_pad - n), (0, d_pad - d)))

    vmem_need = fixed + 2 * 2 * tm * d_pad * itemsize
    vmem_limit = int(min(max(vmem_need + (8 << 20), 16 << 20), 56 << 20))

    cost = pl.CostEstimate(
        flops=int(4.0 * n_pad * d_pad * d_pad + 4.0 * n_pad * d_pad),
        transcendentals=0,
        bytes_accessed=int(2 * n_pad * d_pad * itemsize
                           + num_par * (2 * d_pad * d_pad + 8 * 128) * 4),
    )

    row_map = lambda p, k, _c=chunks_per_par: (p * _c + k, 0)
    par_map = lambda p, k: (p, 0, 0)

    a_out, b_out, misc_out = pl.pallas_call(
        _gram_chunk_kernel,
        out_shape=(
            jax.ShapeDtypeStruct((num_par, d_pad, d_pad), jnp.float32),
            jax.ShapeDtypeStruct((num_par, d_pad, d_pad), jnp.float32),
            jax.ShapeDtypeStruct((num_par, 8, 128), jnp.float32),
        ),
        grid_spec=pltpu.PrefetchScalarGridSpec(
            num_scalar_prefetch=0,
            grid=(num_par, chunks_per_par),
            in_specs=[
                pl.BlockSpec((tm, d_pad), row_map),   # X row chunk
                pl.BlockSpec((tm, d_pad), row_map),   # Y row chunk
            ],
            out_specs=[
                pl.BlockSpec((1, d_pad, d_pad), par_map),
                pl.BlockSpec((1, d_pad, d_pad), par_map),
                pl.BlockSpec((1, 8, 128), par_map),
            ],
        ),
        compiler_params=pltpu.CompilerParams(
            dimension_semantics=("parallel", "arbitrary"),
            vmem_limit_bytes=vmem_limit,
        ),
        cost_estimate=cost,
    )(x, y)

    # Tiny XLA epilogue: combine parallel-group partials, then one DxD
    # product/reduce.  (sum(A*B) is not additive over row groups, hence the
    # group-sum must happen before the product.)
    gram_x = jnp.sum(a_out, axis=0)              # (Dp, Dp) = X^T X
    gram_y = jnp.sum(b_out, axis=0)              # (Dp, Dp) = Y^T Y
    partials = jnp.sum(misc_out[:, 0, :], axis=0)

    sum_gg = jnp.sum(gram_x * gram_y)            # = sum_{i,j} G[i,j]^2
    trace_g = partials[0]                        # trace(G) = sum(X * Y)
    diag_sq = partials[1]                        # sum_i G[i,i]^2
    xnorm2 = jnp.trace(gram_x)                   # ||X||_F^2
    ynorm2 = jnp.trace(gram_y)                   # ||Y||_F^2

    n_f = jnp.float32(n)
    diag_term = 2.0 * trace_g / n_f
    off_diag_term = (sum_gg - diag_sq) / (n_f * (n_f - 1.0))
    loss = off_diag_term - diag_term
    reg_term = jnp.float32(reg) * (xnorm2 + ynorm2) * 0.5
    return loss + reg_term


def _reference_loss(inputs, lagged, reg: float = 1e-5):
    """Pure-JAX reference mirroring the PyTorch semantics."""
    n, d = inputs.shape
    diag = 2.0 * jnp.mean(inputs * lagged) * d
    sq = (inputs @ lagged.T) ** 2
    off_diag = (jnp.sum(sq) - jnp.sum(jnp.diagonal(sq))) / (n * (n - 1))
    loss = off_diag - diag
    reg_term = reg * (jnp.sum(inputs ** 2) + jnp.sum(lagged ** 2)) / 2.0
    return loss + reg_term


if __name__ == "__main__":
    key = jax.random.PRNGKey(0)
    k1, k2, k3, k4, k5, k6 = jax.random.split(key, 6)

    # Case 1: tiny single-chunk case, feature axis padded 32 -> 128 lanes.
    N, D = 8, 32
    inputs = jax.random.normal(k1, (N, D), dtype=jnp.float32)
    lagged = jax.random.normal(k2, (N, D), dtype=jnp.float32)
    out = jax.block_until_ready(reg_spectral_loss(inputs, lagged, reg=1e-5))
    ref = _reference_loss(inputs, lagged, reg=1e-5)
    assert jnp.allclose(out, ref, rtol=2e-4, atol=2e-4), (out, ref)

    # Case 2: default chunking (single large chunk), padding on the feature axis.
    N2, D2 = 256, 160
    inputs2 = jax.random.normal(k3, (N2, D2), dtype=jnp.float32)
    lagged2 = jax.random.normal(k4, (N2, D2), dtype=jnp.float32)
    out2 = jax.block_until_ready(reg_spectral_loss(inputs2, lagged2, reg=1e-5))
    ref2 = _reference_loss(inputs2, lagged2, reg=1e-5)
    assert jnp.allclose(out2, ref2, rtol=2e-4, atol=2e-4), (out2, ref2)

    # Case 3: force multiple row chunks (max_chunk_rows=64) to exercise the
    # cross-chunk Gram accumulation, the 2-way parallel split (odd chunk count
    # padded to even) and zero row padding (272 -> 384 rows).
    N3, D3 = 272, 96
    inputs3 = jax.random.normal(k5, (N3, D3), dtype=jnp.float32)
    lagged3 = jax.random.normal(k6, (N3, D3), dtype=jnp.float32)
    out3 = jax.block_until_ready(
        reg_spectral_loss(inputs3, lagged3, reg=1e-5, max_chunk_rows=64))
    ref3 = _reference_loss(inputs3, lagged3, reg=1e-5)
    assert jnp.allclose(out3, ref3, rtol=2e-4, atol=2e-4), (out3, ref3)

    print("KERNEL_OK")
</pallas_src>

<mosaic_0001>
module attributes {stable_mosaic.version = 11 : i64} {
  func.func @_gram_chunk_kernel(%arg0: i32, %arg1: i32, %arg2: memref<8x128xf32, #tpu.memory_space<vmem>>, %arg3: memref<8x128xf32, #tpu.memory_space<vmem>>, %arg4: memref<1x128x128xf32, #tpu.memory_space<vmem>>, %arg5: memref<1x128x128xf32, #tpu.memory_space<vmem>>, %arg6: memref<1x8x128xf32, #tpu.memory_space<vmem>>) attributes {dimension_semantics = [#tpu.dimension_semantics<parallel>, #tpu.dimension_semantics<arbitrary>], iteration_bounds = array<i64: 1, 1>, scalar_prefetch = 0 : i64, scratch_operands = 0 : i64, tpu.core_type = #tpu.core_type<tc>, window_params = [{transform_indices = @transform_0, window_bounds = array<i64: 8, 128>}, {transform_indices = @transform_1, window_bounds = array<i64: 8, 128>}, {transform_indices = @transform_2, window_bounds = array<i64: 1, 128, 128>}, {transform_indices = @transform_3, window_bounds = array<i64: 1, 128, 128>}, {transform_indices = @transform_4, window_bounds = array<i64: 1, 8, 128>}]} {
    %c0_i32 = arith.constant 0 : i32
    %0 = arith.cmpi eq, %arg1, %c0_i32 : i32
    %1 = arith.extui %0 : i1 to i32
    %c0_i32_0 = arith.constant 0 : i32
    %2 = arith.cmpi ne, %1, %c0_i32_0 : i32
    scf.if %2 {
      %cst_28 = arith.constant 0.000000e+00 : f32
      %40 = vector.broadcast %cst_28 : f32 to vector<1x128x128xf32>
      %c0_29 = arith.constant 0 : index
      %c0_30 = arith.constant 0 : index
      %c0_31 = arith.constant 0 : index
      %41 = vector.load %arg4[%c0_29, %c0_30, %c0_31] : memref<1x128x128xf32, #tpu.memory_space<vmem>>, vector<1x128x128xf32>
      tpu.vector_store %arg4[%c0_29, %c0_30, %c0_31], %40 {strides = array<i32>} : memref<1x128x128xf32, #tpu.memory_space<vmem>>, vector<1x128x128xf32>,
      %cst_32 = arith.constant 0.000000e+00 : f32
      %42 = vector.broadcast %cst_32 : f32 to vector<1x128x128xf32>
      %c0_33 = arith.constant 0 : index
      %c0_34 = arith.constant 0 : index
      %c0_35 = arith.constant 0 : index
      %43 = vector.load %arg5[%c0_33, %c0_34, %c0_35] : memref<1x128x128xf32, #tpu.memory_space<vmem>>, vector<1x128x128xf32>
      tpu.vector_store %arg5[%c0_33, %c0_34, %c0_35], %42 {strides = array<i32>} : memref<1x128x128xf32, #tpu.memory_space<vmem>>, vector<1x128x128xf32>,
      %cst_36 = arith.constant 0.000000e+00 : f32
      %44 = vector.broadcast %cst_36 : f32 to vector<1x8x128xf32>
      %c0_37 = arith.constant 0 : index
      %c0_38 = arith.constant 0 : index
      %c0_39 = arith.constant 0 : index
      %45 = vector.load %arg6[%c0_37, %c0_38, %c0_39] : memref<1x8x128xf32, #tpu.memory_space<vmem>>, vector<1x8x128xf32>
      tpu.vector_store %arg6[%c0_37, %c0_38, %c0_39], %44 {strides = array<i32>} : memref<1x8x128xf32, #tpu.memory_space<vmem>>, vector<1x8x128xf32>,
    } else {
    }
    %c0 = arith.constant 0 : index
    %c0_1 = arith.constant 0 : index
    %3 = vector.load %arg2[%c0, %c0_1] : memref<8x128xf32, #tpu.memory_space<vmem>>, vector<8x128xf32>
    %c0_2 = arith.constant 0 : index
    %c0_3 = arith.constant 0 : index
    %4 = vector.load %arg3[%c0_2, %c0_3] : memref<8x128xf32, #tpu.memory_space<vmem>>, vector<8x128xf32>
    %cst = arith.constant dense<0.000000e+00> : vector<128x128xf32>
    %5 = tpu.matmul %3, %3, %cst {dimension_numbers = #tpu.dot_dimension_numbers<[0], [0], [1], [1], [0, 1, 1, 1], [], []>} : vector<8x128xf32>, vector<8x128xf32>, vector<128x128xf32> -> vector<128x128xf32>
    %cst_4 = arith.constant dense<0.000000e+00> : vector<128x128xf32>
    %6 = tpu.matmul %4, %4, %cst_4 {dimension_numbers = #tpu.dot_dimension_numbers<[0], [0], [1], [1], [0, 1, 1, 1], [], []>} : vector<8x128xf32>, vector<8x128xf32>, vector<128x128xf32> -> vector<128x128xf32>
    %c0_5 = arith.constant 0 : index
    %c0_6 = arith.constant 0 : index
    %c0_7 = arith.constant 0 : index
    %7 = vector.load %arg4[%c0_5, %c0_6, %c0_7] : memref<1x128x128xf32, #tpu.memory_space<vmem>>, vector<1x128x128xf32>
    %8 = vector.shape_cast %5 : vector<128x128xf32> to vector<1x128x128xf32>
    %9 = arith.addf %7, %8 : vector<1x128x128xf32>
    %c0_8 = arith.constant 0 : index
    %c0_9 = arith.constant 0 : index
    %c0_10 = arith.constant 0 : index
    %10 = vector.load %arg4[%c0_8, %c0_9, %c0_10] : memref<1x128x128xf32, #tpu.memory_space<vmem>>, vector<1x128x128xf32>
    tpu.vector_store %arg4[%c0_8, %c0_9, %c0_10], %9 {strides = array<i32>} : memref<1x128x128xf32, #tpu.memory_space<vmem>>, vector<1x128x128xf32>,
    %c0_11 = arith.constant 0 : index
    %c0_12 = arith.constant 0 : index
    %c0_13 = arith.constant 0 : index
    %11 = vector.load %arg5[%c0_11, %c0_12, %c0_13] : memref<1x128x128xf32, #tpu.memory_space<vmem>>, vector<1x128x128xf32>
    %12 = vector.shape_cast %6 : vector<128x128xf32> to vector<1x128x128xf32>
    %13 = arith.addf %11, %12 : vector<1x128x128xf32>
    %c0_14 = arith.constant 0 : index
    %c0_15 = arith.constant 0 : index
    %c0_16 = arith.constant 0 : index
    %14 = vector.load %arg5[%c0_14, %c0_15, %c0_16] : memref<1x128x128xf32, #tpu.memory_space<vmem>>, vector<1x128x128xf32>
    tpu.vector_store %arg5[%c0_14, %c0_15, %c0_16], %13 {strides = array<i32>} : memref<1x128x128xf32, #tpu.memory_space<vmem>>, vector<1x128x128xf32>,
    %15 = arith.mulf %3, %4 : vector<8x128xf32>
    %cst_17 = arith.constant dense<0.000000e+00> : vector<8xf32>
    %16 = vector.multi_reduction <add>, %15, %cst_17 [1] : vector<8x128xf32> to vector<8xf32>
    %17 = vector.shape_cast %16 : vector<8xf32> to vector<8x1xf32>
    %18 = vector.shape_cast %17 : vector<8x1xf32> to vector<1x8x1xf32>
    %cst_18 = arith.constant dense<0.000000e+00> : vector<1xf32>
    %19 = vector.multi_reduction <add>, %18, %cst_18 [1, 2] : vector<1x8x1xf32> to vector<1xf32>
    %20 = vector.shape_cast %19 : vector<1xf32> to vector<1x1x1xf32>
    %21 = vector.extract %20[0, 0, 0] : f32 from vector<1x1x1xf32>
    %22 = arith.mulf %17, %17 : vector<8x1xf32>
    %23 = vector.shape_cast %22 : vector<8x1xf32> to vector<1x8x1xf32>
    %cst_19 = arith.constant dense<0.000000e+00> : vector<1xf32>
    %24 = vector.multi_reduction <add>, %23, %cst_19 [1, 2] : vector<1x8x1xf32> to vector<1xf32>
    %25 = vector.shape_cast %24 : vector<1xf32> to vector<1x1x1xf32>
    %26 = vector.extract %25[0, 0, 0] : f32 from vector<1x1x1xf32>
    %27 = tpu.iota {dimensions = array<i32: 2>} : vector<1x8x128xi32>
    %c0_20 = arith.constant 0 : index
    %c0_21 = arith.constant 0 : index
    %c0_22 = arith.constant 0 : index
    %28 = vector.load %arg6[%c0_20, %c0_21, %c0_22] : memref<1x8x128xf32, #tpu.memory_space<vmem>>, vector<1x8x128xf32>
    %c0_i32_23 = arith.constant 0 : i32
    %29 = vector.broadcast %c0_i32_23 : i32 to vector<1x8x128xi32>
    %30 = arith.cmpi eq, %27, %29 : vector<1x8x128xi32>
    %c1_i32 = arith.constant 1 : i32
    %31 = vector.broadcast %c1_i32 : i32 to vector<1x8x128xi32>
    %32 = arith.cmpi eq, %27, %31 : vector<1x8x128xi32>
    %cst_24 = arith.constant 0.000000e+00 : f32
    %33 = vector.broadcast %26 : f32 to vector<1x8x128xf32>
    %34 = vector.broadcast %cst_24 : f32 to vector<1x8x128xf32>
    %35 = arith.select %32, %33, %34 : vector<1x8x128xi1>, vector<1x8x128xf32>
    %36 = vector.broadcast %21 : f32 to vector<1x8x128xf32>
    %37 = arith.select %30, %36, %35 : vector<1x8x128xi1>, vector<1x8x128xf32>
    %38 = arith.addf %28, %37 : vector<1x8x128xf32>
    %c0_25 = arith.constant 0 : index
    %c0_26 = arith.constant 0 : index
    %c0_27 = arith.constant 0 : index
    %39 = vector.load %arg6[%c0_25, %c0_26, %c0_27] : memref<1x8x128xf32, #tpu.memory_space<vmem>>, vector<1x8x128xf32>
    tpu.vector_store %arg6[%c0_25, %c0_26, %c0_27], %38 {strides = array<i32>} : memref<1x8x128xf32, #tpu.memory_space<vmem>>, vector<1x8x128xf32>,
    return
  }
  func.func @transform_0(%arg0: i32, %arg1: i32) -> (i32, i32) {
    %c1_i32 = arith.constant 1 : i32
    %0 = arith.muli %arg0, %c1_i32 : i32
    %1 = arith.addi %0, %arg1 : i32
    %c0_i32 = arith.constant 0 : i32
    %c0_i32_0 = arith.constant 0 : i32
    return %1, %c0_i32 : i32, i32
  }
  func.func @transform_1(%arg0: i32, %arg1: i32) -> (i32, i32) {
    %c1_i32 = arith.constant 1 : i32
    %0 = arith.muli %arg0, %c1_i32 : i32
    %1 = arith.addi %0, %arg1 : i32
    %c0_i32 = arith.constant 0 : i32
    %c0_i32_0 = arith.constant 0 : i32
    return %1, %c0_i32 : i32, i32
  }
  func.func @transform_2(%arg0: i32, %arg1: i32) -> (i32, i32, i32) {
    %c0_i32 = arith.constant 0 : i32
    %c0_i32_0 = arith.constant 0 : i32
    %c0_i32_1 = arith.constant 0 : i32
    return %arg0, %c0_i32, %c0_i32_0 : i32, i32, i32
  }
  func.func @transform_3(%arg0: i32, %arg1: i32) -> (i32, i32, i32) {
    %c0_i32 = arith.constant 0 : i32
    %c0_i32_0 = arith.constant 0 : i32
    %c0_i32_1 = arith.constant 0 : i32
    return %arg0, %c0_i32, %c0_i32_0 : i32, i32, i32
  }
  func.func @transform_4(%arg0: i32, %arg1: i32) -> (i32, i32, i32) {
    %c0_i32 = arith.constant 0 : i32
    %c0_i32_0 = arith.constant 0 : i32
    %c0_i32_1 = arith.constant 0 : i32
    return %arg0, %c0_i32, %c0_i32_0 : i32, i32, i32
  }
}

</mosaic_0001>

<bundles_post_ra>
// kernel: tpu_custom_call.1
= control target key start
LH: loop header
LB: loop body
LE: loop exit
PB: predicated region body
PF: predicated region fallthrough
CT: control target
= control target key end

     0   :  { %10 = vsyncpa [#allocation3], 0  ;;  %s826_s0 = inlined_call_operand.hbm [shape: f32[8,128], index: 0, kind: input, shape index: {}]   ;;  %s827_s1 = inlined_call_operand.hbm [shape: f32[8,128], index: 1, kind: input, shape index: {}]   ;;  %s828_s2 = inlined_call_operand.hbm [shape: f32[1,128,128], index: 2, kind: output, shape index: {0}]   ;;  %s829_s3 = inlined_call_operand.hbm [shape: f32[1,128,128], index: 3, kind: output, shape index: {1}]   ;;  %s830_s4 = inlined_call_operand.hbm [shape: f32[1,8,128], index: 4, kind: output, shape index: {2}]  }
   0x1   :  { %11 = vsyncpa [#allocation6], 0 }
   0x2   :  { %12 = vsyncpa [#allocation4], 0 }
   0x3   :  { %13 = vsyncpa [#allocation9], 0  ;;  %s22_s17 = sshll.u32 %s826_s0, 4  ;;  %s741_s18 = smov [#allocation2]   ;;  %s23_s17 = int_to_ptr.hbm [resolvable:$true] %s22_s17 }
   0x4   :  { %s24_s19 = sshll.u32 %s741_s18, 4  ;;  %s36_s22 = sshll.u32 %s827_s1, 4  ;;  %s25_s19 = int_to_ptr.vmem [resolvable:$true] %s24_s19  ;;  %s37_s22 = int_to_ptr.hbm [resolvable:$true] %s36_s22 }
   0x5   :  { %27 = dma.hbm_to_vmem [thread:$0]  %s23_s17, 128, %s25_s19, [#allocation3]  }
   0x6   :  { %s742_s23 = smov [#allocation5]  }
   0x7   :  { %s38_s24 = sshll.u32 %s742_s23, 4  ;;  %s39_s24 = int_to_ptr.vmem [resolvable:$true] %s38_s24 }
   0x8   :  { %41 = dma.hbm_to_vmem [thread:$0]  %s37_s22, 128, %s39_s24, [#allocation6]  }
   0x9   :  { %733 = dma.done.wait [#allocation3], 128  }
   0xa   :  { %734 = vsyncadd [#allocation3], 4294967168 }
   0xb   :  { %735 = dma.done.wait [#allocation6], 128  }
   0xc   :  { %736 = vsyncadd [#allocation6], 4294967168  ;;  %v90_v0 = vld [vmem:[#allocation5] sm:$0xff]  ;;  %v89_v1 = vld [vmem:[#allocation2] sm:$0xff]  ;;  %vm123_vm0 = vcmask 64512   ;;  %vm481_vm1 = vcmask 7168  }
   0xd   :  { %237 = vxpose.xlu0.b32.start.end [1/1] (short) %v90_v0, 128  ;;  %332 = vmatpush.msra.mxu1 %v90_v0  ;;  %v478_v7 = vmul.f32 %v90_v0, %v89_v1  ;;  %s743_s0 = smov [#allocation8]   ;;  %s533_s27 = sshll.u32 %s829_s3, 4  ;;  %s534_s27 = int_to_ptr.hbm [resolvable:$true] %s533_s27 }
   0xe   :  { %600 = vmatpush.msra.mxu3 %v90_v0  ;;  %187 = vmatpush.msra.mxu0 %v89_v1  ;;  %s531_s1 = sshll.u32 %s743_s0, 4  ;;  %s744_s28 = smov 128   ;;  %s532_s1 = int_to_ptr.vmem [resolvable:$true] %s531_s1 }
   0xf   :  { %599 = vmatpush.msra.mxu2 %v89_v1  ;;  %479 = vadd.xlane.f32.xlu1 %v478_v7  ;;  %s745_s29 = smov 8   ;;  %s746_s5 = smov [#allocation10]  }
  0x10   :  { %s545_s6 = sshll.u32 %s746_s5, 4  ;;  %s547_s9 = sshll.u32 %s830_s4, 4  ;;  %s546_s6 = int_to_ptr.vmem [resolvable:$true] %s545_s6  ;;  %s548_s9 = int_to_ptr.hbm [resolvable:$true] %s547_s9 }
  0x11   :  { %s747_s10 = smov [#allocation7]   ;;  %s520_s4 = sshll.u32 %s828_s2, 4  ;;  %s521_s4 = int_to_ptr.hbm [resolvable:$true] %s520_s4 }
  0x12   :  { %s518_s11 = sshll.u32 %s747_s10, 4  ;;  %s519_s11 = int_to_ptr.vmem [resolvable:$true] %s518_s11 }
  0x82   :  { %v480_v27 = vpop.xlane.xlu1 %479 }
  0x83   :  { %v492_v28 = vmul.f32 %v480_v27, %v480_v27  ;;  %v482_v29 = vsel %vm481_vm1, %v480_v27, 0.0 }
  0x84   :  { %483 = vadd.xlane.f32.xlu1 %v482_v29 }
  0x85   :  { %v493_v31 = vsel %vm481_vm1, %v492_v28, 0.0 }
  0x86   :  { %494 = vadd.xlane.f32.xlu2 %v493_v31 }
  0x8d   :  { %91 = vxpose.xlu0.b32.start.end [1/1] (short) %v89_v1, 128 }
  0xb1   :  { %v253_v2 = vpop.trf.xlu0 }
  0xb2   :  { %583 = vmatmul.msk.f32.vlgmr.msra.gmra.mxu1 %vm123_vm0, %v253_v2 }
  0xb9   :  { %v254_v3 = vpop.trf.xlu0 }
  0xba   :  { %584 = vmatmul.msk.f32.gmra.mxu1 %vm123_vm0, %v254_v3 }
  0xc1   :  { %v255_v4 = vpop.trf.xlu0 }
  0xc2   :  { %585 = vmatmul.msk.f32.gmra.mxu1 %vm123_vm0, %v255_v4 }
  0xc9   :  { %v256_v5 = vpop.trf.xlu0 }
  0xca   :  { %586 = vmatmul.msk.f32.gmra.mxu1 %vm123_vm0, %v256_v5 }
  0xd1   :  { %v257_v6 = vpop.trf.xlu0 }
  0xd2   :  { %587 = vmatmul.msk.f32.gmra.mxu1 %vm123_vm0, %v257_v6 }
  0xd9   :  { %v258_v8 = vpop.trf.xlu0 }
  0xda   :  { %588 = vmatmul.msk.f32.gmra.mxu1 %vm123_vm0, %v258_v8 }
  0xe1   :  { %v259_v9 = vpop.trf.xlu0 }
  0xe2   :  { %589 = vmatmul.msk.f32.gmra.mxu1 %vm123_vm0, %v259_v9 }
  0xe9   :  { %v260_v10 = vpop.trf.xlu0 }
  0xea   :  { %590 = vmatmul.msk.f32.gmra.mxu1 %vm123_vm0, %v260_v10 }
  0xf1   :  { %v261_v11 = vpop.trf.xlu0 }
  0xf2   :  { %591 = vmatmul.msk.f32.vlgmr.msra.gmra.mxu3 %vm123_vm0, %v261_v11 }
  0xf7   :  { %v484_v58 = vpop.xlane.xlu1 %483 }
  0xf8   :  { %v485_v60 = vrot.slane %v484_v58, 4 }
  0xf9   :  { %v262_v12 = vpop.trf.xlu0  ;;  %v495_v59 = vpop.xlane.xlu2 %494 }
  0xfa   :  { %592 = vmatmul.msk.f32.gmra.mxu3 %vm123_vm0, %v262_v12  ;;  %v496_v61 = vrot.slane %v495_v59, 4  ;;  %v486_v62 = vadd.f32 %v485_v60, %v484_v58 }
  0xfc   :  { %v497_v63 = vadd.f32 %v496_v61, %v495_v59  ;;  %v487_v1 = vrot.slane %v486_v62, 2 }
  0xfe   :  { %v498_v2 = vrot.slane %v497_v63, 2  ;;  %v488_v4 = vadd.f32 %v487_v1, %v486_v62 }
 0x100   :  { %v499_v3 = vadd.f32 %v498_v2, %v497_v63  ;;  %v489_v5 = vrot.slane %v488_v4, 1 }
 0x101   :  { %v263_v13 = vpop.trf.xlu0 }
 0x102   :  { %593 = vmatmul.msk.f32.gmra.mxu3 %vm123_vm0, %v263_v13  ;;  %v500_v6 = vrot.slane %v499_v3, 1  ;;  %v490_v7 = vadd.f32 %v489_v5, %v488_v4 }
 0x104   :  { %v501_v8 = vadd.f32 %v500_v6, %v499_v3  ;;  %601 = vpush %v490_v7 }
 0x106   :  { %603 = vpush %v501_v8 }
 0x109   :  { %v264_v14 = vpop.trf.xlu0 }
 0x10a   :  { %594 = vmatmul.msk.f32.gmra.mxu3 %vm123_vm0, %v264_v14 }
 0x111   :  { %v265_v15 = vpop.trf.xlu0 }
 0x112   :  { %595 = vmatmul.msk.f32.gmra.mxu3 %vm123_vm0, %v265_v15  ;;  %v503_v15 = vlaneseq }
 0x119   :  { %v266_v16 = vpop.trf.xlu0 }
 0x11a   :  { %596 = vmatmul.msk.f32.gmra.mxu3 %vm123_vm0, %v266_v16  ;;  %v504_v16 = vand.u32 127, %v503_v15 }
 0x11c   :  { %vm506_vm2 = vcmp.eq.s32.totalorder %v504_v16, 0  ;;  %vm507_vm3 = vcmp.eq.s32.totalorder %v504_v16, 1 }
 0x121   :  { %v267_v17 = vpop.trf.xlu0 }
 0x122   :  { %597 = vmatmul.msk.f32.gmra.mxu3 %vm123_vm0, %v267_v17 }
 0x129   :  { %v268_v18 = vpop.trf.xlu0 }
 0x12a   :  { %598 = vmatmul.msk.f32.gmra.mxu3 %vm123_vm0, %v268_v18 }
 0x12f   :  { %v334_v19 = vpop.f32.mrf.mxu1 }
 0x130   :  { %462 = vst [vmem:[#allocation8] sm:$0xff] %v334_v19 }
 0x131   :  { %v107_v20 = vpop.trf.xlu0 }
 0x132   :  { %567 = vmatmul.msk.f32.vlgmr.msra.gmra.mxu0 %vm123_vm0, %v107_v20 }
 0x135   :  { %s602_s3 = spop %601 }
 0x136   :  { %v510_v17 = vstv %s602_s3 }
 0x137   :  { %v337_v21 = vpop.f32.mrf.mxu1  ;;  %s604_s30 = spop %603 }
 0x138   :  { %463 = vst [vmem:[#allocation8 + $0x8] sm:$0xff] %v337_v21  ;;  %v508_v18 = vstv %s604_s30 }
 0x139   :  { %v108_v22 = vpop.trf.xlu0  ;;  %v509_v19 = vsel %vm507_vm3, %v508_v18, 0.0 }
 0x13a   :  { %568 = vmatmul.msk.f32.gmra.mxu0 %vm123_vm0, %v108_v22  ;;  %v511_v21 = vsel %vm506_vm2, %v510_v17, %v509_v19 }
 0x13b   :  { %513 = vst [vmem:[#allocation10] sm:$0xff] %v511_v21 }
 0x13f   :  { %v340_v23 = vpop.f32.mrf.mxu1 }
 0x140   :  { %464 = vst [vmem:[#allocation8 + $0x10] sm:$0xff] %v340_v23 }
 0x141   :  { %v109_v24 = vpop.trf.xlu0 }
 0x142   :  { %569 = vmatmul.msk.f32.gmra.mxu0 %vm123_vm0, %v109_v24 }
 0x147   :  { %v343_v25 = vpop.f32.mrf.mxu1 }
 0x148   :  { %465 = vst [vmem:[#allocation8 + $0x18] sm:$0xff] %v343_v25 }
 0x149   :  { %v110_v26 = vpop.trf.xlu0 }
 0x14a   :  { %570 = vmatmul.msk.f32.gmra.mxu0 %vm123_vm0, %v110_v26 }
 0x14f   :  { %v346_v30 = vpop.f32.mrf.mxu1 }
 0x150   :  { %466 = vst [vmem:[#allocation8 + $0x20] sm:$0xff] %v346_v30 }
 0x151   :  { %v111_v32 = vpop.trf.xlu0 }
 0x152   :  { %571 = vmatmul.msk.f32.gmra.mxu0 %vm123_vm0, %v111_v32 }
 0x157   :  { %v349_v33 = vpop.f32.mrf.mxu1 }
 0x158   :  { %467 = vst [vmem:[#allocation8 + $0x28] sm:$0xff] %v349_v33 }
 0x159   :  { %v112_v34 = vpop.trf.xlu0 }
 0x15a   :  { %572 = vmatmul.msk.f32.gmra.mxu0 %vm123_vm0, %v112_v34 }
 0x15f   :  { %v352_v35 = vpop.f32.mrf.mxu1 }
 0x160   :  { %468 = vst [vmem:[#allocation8 + $0x30] sm:$0xff] %v352_v35 }
 0x161   :  { %v113_v36 = vpop.trf.xlu0 }
 0x162   :  { %573 = vmatmul.msk.f32.gmra.mxu0 %vm123_vm0, %v113_v36 }
 0x167   :  { %v355_v37 = vpop.f32.mrf.mxu1 }
 0x168   :  { %469 = vst [vmem:[#allocation8 + $0x38] sm:$0xff] %v355_v37 }
 0x169   :  { %v114_v38 = vpop.trf.xlu0 }
 0x16a   :  { %574 = vmatmul.msk.f32.gmra.mxu0 %vm123_vm0, %v114_v38 }
 0x171   :  { %v115_v39 = vpop.trf.xlu0 }
 0x172   :  { %575 = vmatmul.msk.f32.vlgmr.msra.gmra.mxu2 %vm123_vm0, %v115_v39 }
 0x175   :  { %v358_v40 = vpop.f32.mrf.mxu3 }
 0x176   :  { %470 = vst [vmem:[#allocation8 + $0x40] sm:$0xff] %v358_v40 }
 0x179   :  { %v116_v41 = vpop.trf.xlu0 }
 0x17a   :  { %576 = vmatmul.msk.f32.gmra.mxu2 %vm123_vm0, %v116_v41 }
 0x17d   :  { %v361_v42 = vpop.f32.mrf.mxu3 }
 0x17e   :  { %471 = vst [vmem:[#allocation8 + $0x48] sm:$0xff] %v361_v42 }
 0x181   :  { %v117_v43 = vpop.trf.xlu0 }
 0x182   :  { %577 = vmatmul.msk.f32.gmra.mxu2 %vm123_vm0, %v117_v43 }
 0x185   :  { %v364_v44 = vpop.f32.mrf.mxu3 }
 0x186   :  { %472 = vst [vmem:[#allocation8 + $0x50] sm:$0xff] %v364_v44 }
 0x189   :  { %v118_v45 = vpop.trf.xlu0 }
 0x18a   :  { %578 = vmatmul.msk.f32.gmra.mxu2 %vm123_vm0, %v118_v45 }
 0x18d   :  { %v367_v46 = vpop.f32.mrf.mxu3 }
 0x18e   :  { %473 = vst [vmem:[#allocation8 + $0x58] sm:$0xff] %v367_v46 }
 0x191   :  { %v119_v47 = vpop.trf.xlu0 }
 0x192   :  { %579 = vmatmul.msk.f32.gmra.mxu2 %vm123_vm0, %v119_v47 }
 0x195   :  { %v370_v48 = vpop.f32.mrf.mxu3 }
 0x196   :  { %474 = vst [vmem:[#allocation8 + $0x60] sm:$0xff] %v370_v48 }
 0x199   :  { %v120_v49 = vpop.trf.xlu0 }
 0x19a   :  { %580 = vmatmul.msk.f32.gmra.mxu2 %vm123_vm0, %v120_v49 }
 0x19d   :  { %v373_v50 = vpop.f32.mrf.mxu3 }
 0x19e   :  { %475 = vst [vmem:[#allocation8 + $0x68] sm:$0xff] %v373_v50 }
 0x1a1   :  { %v121_v51 = vpop.trf.xlu0 }
 0x1a2   :  { %581 = vmatmul.msk.f32.gmra.mxu2 %vm123_vm0, %v121_v51 }
 0x1a5   :  { %v376_v52 = vpop.f32.mrf.mxu3 }
 0x1a6   :  { %476 = vst [vmem:[#allocation8 + $0x70] sm:$0xff] %v376_v52 }
 0x1a9   :  { %v122_v53 = vpop.trf.xlu0 }
 0x1aa   :  { %582 = vmatmul.msk.f32.gmra.mxu2 %vm123_vm0, %v122_v53 }
 0x1ad   :  { %v379_v54 = vpop.f32.mrf.mxu3 }
 0x1ae   :  { %477 = vst [vmem:[#allocation8 + $0x78] sm:$0xff] %v379_v54 }
 0x1af   :  { %v189_v55 = vpop.f32.mrf.mxu0  ;;  %539 = dma.vmem_to_hbm [thread:$0]  %s532_s1, 2048, %s534_s27, [#allocation9], %s744_s28, %s744_s28, %s745_s29  }
 0x1b0   :  { %414 = vst [vmem:[#allocation7] sm:$0xff] %v189_v55  ;;  %550 = dma.vmem_to_hbm [thread:$0]  %s546_s6, 128, %s548_s9, [#allocation9]  }
 0x1b7   :  { %v192_v56 = vpop.f32.mrf.mxu0 }
 0x1b8   :  { %415 = vst [vmem:[#allocation7 + $0x8] sm:$0xff] %v192_v56 }
 0x1bf   :  { %v195_v57 = vpop.f32.mrf.mxu0 }
 0x1c0   :  { %416 = vst [vmem:[#allocation7 + $0x10] sm:$0xff] %v195_v57 }
 0x1c7   :  { %v198_v0 = vpop.f32.mrf.mxu0 }
 0x1c8   :  { %417 = vst [vmem:[#allocation7 + $0x18] sm:$0xff] %v198_v0 }
 0x1cf   :  { %v201_v9 = vpop.f32.mrf.mxu0 }
 0x1d0   :  { %418 = vst [vmem:[#allocation7 + $0x20] sm:$0xff] %v201_v9 }
 0x1d7   :  { %v204_v10 = vpop.f32.mrf.mxu0 }
 0x1d8   :  { %419 = vst [vmem:[#allocation7 + $0x28] sm:$0xff] %v204_v10 }
 0x1df   :  { %v207_v11 = vpop.f32.mrf.mxu0 }
 0x1e0   :  { %420 = vst [vmem:[#allocation7 + $0x30] sm:$0xff] %v207_v11 }
 0x1e7   :  { %v210_v12 = vpop.f32.mrf.mxu0 }
 0x1e8   :  { %421 = vst [vmem:[#allocation7 + $0x38] sm:$0xff] %v210_v12 }
 0x1f5   :  { %v213_v13 = vpop.f32.mrf.mxu2 }
 0x1f6   :  { %422 = vst [vmem:[#allocation7 + $0x40] sm:$0xff] %v213_v13 }
 0x1fd   :  { %v216_v14 = vpop.f32.mrf.mxu2 }
 0x1fe   :  { %423 = vst [vmem:[#allocation7 + $0x48] sm:$0xff] %v216_v14 }
 0x205   :  { %v219_v20 = vpop.f32.mrf.mxu2 }
 0x206   :  { %424 = vst [vmem:[#allocation7 + $0x50] sm:$0xff] %v219_v20 }
 0x20d   :  { %v222_v22 = vpop.f32.mrf.mxu2 }
 0x20e   :  { %425 = vst [vmem:[#allocation7 + $0x58] sm:$0xff] %v222_v22 }
 0x215   :  { %v225_v23 = vpop.f32.mrf.mxu2 }
 0x216   :  { %426 = vst [vmem:[#allocation7 + $0x60] sm:$0xff] %v225_v23 }
 0x21d   :  { %v228_v24 = vpop.f32.mrf.mxu2 }
 0x21e   :  { %427 = vst [vmem:[#allocation7 + $0x68] sm:$0xff] %v228_v24 }
 0x225   :  { %v231_v25 = vpop.f32.mrf.mxu2 }
 0x226   :  { %428 = vst [vmem:[#allocation7 + $0x70] sm:$0xff] %v231_v25 }
 0x22d   :  { %v234_v26 = vpop.f32.mrf.mxu2 }
 0x22e   :  { %429 = vst [vmem:[#allocation7 + $0x78] sm:$0xff] %v234_v26 }
 0x22f   :  { %526 = dma.vmem_to_hbm [thread:$0]  %s519_s11, 2048, %s521_s4, [#allocation4], %s744_s28, %s744_s28, %s745_s29  }
 0x230   :  { %737 = dma.done.wait [#allocation4], 2048  }
 0x231   :  { %738 = vsyncadd [#allocation4], 4294965248 }
 0x232   :  { %739 = dma.done.wait [#allocation9], 2176  }
 0x233   :  { %740 = vsyncadd [#allocation9], 4294965120 }
 0x234   :  { %563 = vsyncpa [#allocation3], 1 }
 0x235   :  { %564 = vsyncpa [#allocation6], 1 }
 0x236   :  { %565 = vsyncpa [#allocation4], 1 }
 0x237   :  { %566 = vsyncpa [#allocation9], 1 }

</bundles_post_ra>
